<compile_context>
chip_gen: v7x
topology: tpu7x:2x2x1
jax: 0.10.0
libtpu: 0.0.40
codegen_flags: <defaults>
</compile_context>

<pallas_src>
import jax
import jax.numpy as jnp
from jax import lax
from jax.experimental import pallas as pl
from jax.experimental.pallas import tpu as pltpu


def _round_up(x, m):
    return ((x + m - 1) // m) * m


# ----------------------------------------------------------------------------
# One-shot kernel: fused weights.  Runs once per parameter set; reused by every
# per-call invocation below.
# ----------------------------------------------------------------------------
def _fused_weight_kernel(act_ref, w1_ref, b1_ref, w2_ref, b2_ref, w3_ref, b3_ref,
                         we_ref, be_ref, wf_ref, bf_ref):
    h = jnp.dot(act_ref[...], w1_ref[...],
                preferred_element_type=jnp.float32) + b1_ref[...]
    h = jnp.maximum(h, 0.0)
    h = jnp.dot(h, w2_ref[...],
                preferred_element_type=jnp.float32) + b2_ref[...]
    h = jnp.maximum(h, 0.0)
    ae = jnp.dot(h, w3_ref[...],
                 preferred_element_type=jnp.float32) + b3_ref[...]        # (A_pad, F)
    # W_fused[i, a] = sum_d We[i, d] * act_emb[a, d]
    wf = lax.dot_general(we_ref[...], ae, (((1,), (1,)), ((), ())),
                         preferred_element_type=jnp.float32)              # (IN, A_pad)
    bf = lax.dot_general(be_ref[...], ae, (((1,), (1,)), ((), ())),
                         preferred_element_type=jnp.float32)              # (1, A_pad)
    wf_ref[...] = wf.astype(wf_ref.dtype)
    bf_ref[...] = bf


def precompute_fused_weights(actions, params, *, param_dtype=jnp.bfloat16):
    """One-shot: W_fused (IN, A_pad) and b_fused (1, A_pad), fully VMEM resident."""
    A, _ = actions.shape
    IN, _ = params["we"].shape
    a_pad = _round_up(A, 128)                       # lane-dense per-call stores
    actions = jnp.pad(actions.astype(jnp.float32), ((0, a_pad - A), (0, 0)))

    inputs = (actions,
              params["w1"], params["b1"],
              params["w2"], params["b2"],
              params["w3"], params["b3"],
              params["we"], params["be"])
    vmem = pl.BlockSpec(memory_space=pltpu.VMEM)
    return pl.pallas_call(
        _fused_weight_kernel,
        out_shape=(jax.ShapeDtypeStruct((IN, a_pad), param_dtype),
                   jax.ShapeDtypeStruct((1, a_pad), jnp.float32)),
        in_specs=[vmem] * len(inputs),
        out_specs=(vmem, vmem),
    )(*inputs)


# ----------------------------------------------------------------------------
# Per-call kernel: out[b, :] = player_emb[b, :] @ W_fused + b_fused
# ----------------------------------------------------------------------------
def _fused_forward_kernel(pe_ref, wf_ref, bf_ref, out_ref):
    out_ref[...] = (jnp.dot(pe_ref[...], wf_ref[...],
                            preferred_element_type=jnp.float32)
                    + bf_ref[...]).astype(out_ref.dtype)


def _choose_block_rows(batch, *, max_rows=8192, target_blocks=2):
    # Small batch: one block total (grid iterations are serial overhead on the
    # 1-TC v5e/v6e and buy nothing on v7x at this size).  Mid-size: at most
    # `target_blocks` blocks so the "parallel" axis shards one block per v7x
    # TensorCore.  Huge: cap the block so the double-buffered working set stays
    # well inside every generation's scoped-VMEM default.
    if batch <= max_rows:
        if batch <= 1024 or target_blocks <= 1:
            return _round_up(batch, 8)
        return _round_up(pl.cdiv(batch, target_blocks), 8)
    return max_rows


def controls_predictor_dot(player_emb, w_fused, b_fused, *, num_actions=None):
    """Per-call forward given precomputed fused weights.  Returns (B, A) scores."""
    B, IN = player_emb.shape
    IN_w, A_pad = w_fused.shape
    assert IN == IN_w
    A = A_pad if num_actions is None else num_actions

    bb = _choose_block_rows(B)
    n_blocks = pl.cdiv(B, bb)

    pe_bytes = jnp.dtype(player_emb.dtype).itemsize
    wf_bytes = jnp.dtype(w_fused.dtype).itemsize
    flops = 2 * n_blocks * bb * IN * A_pad
    bytes_accessed = (n_blocks * bb * IN * pe_bytes          # player_emb stream
                      + IN * A_pad * wf_bytes                # resident weight
                      + A_pad * 4                            # resident bias
                      + n_blocks * bb * A_pad * 4)           # output

    out = pl.pallas_call(
        _fused_forward_kernel,
        out_shape=jax.ShapeDtypeStruct((B, A_pad), jnp.float32),
        grid=(n_blocks,),
        in_specs=[
            pl.BlockSpec((bb, IN), lambda i: (i, 0)),        # player_emb: streamed over B
            pl.BlockSpec((IN, A_pad), lambda i: (0, 0)),     # W_fused: VMEM-resident
            pl.BlockSpec((1, A_pad), lambda i: (0, 0)),      # b_fused: VMEM-resident
        ],
        out_specs=pl.BlockSpec((bb, A_pad), lambda i: (i, 0)),
        compiler_params=pltpu.CompilerParams(
            dimension_semantics=("parallel",),
            vmem_limit_bytes=32 * 1024 * 1024),
        cost_estimate=pl.CostEstimate(
            flops=flops, transcendentals=0, bytes_accessed=bytes_accessed),
    )(player_emb, w_fused, b_fused)

    # Kernel stores are lane-dense (A_pad multiple of 128); trim pad columns once.
    # TODO(synk): for very large B, prefer the transposed (A, B) output layout
    # in-kernel instead of this wrapper slice.
    return out if A == A_pad else out[:, :A]


def controls_predictor_forward(player_emb, actions, params, *,
                               param_dtype=jnp.bfloat16):
    """Full module forward (one-shot precompute + per-call kernel)."""
    A = actions.shape[0]
    w_fused, b_fused = precompute_fused_weights(actions, params,
                                                param_dtype=param_dtype)
    return controls_predictor_dot(player_emb, w_fused, b_fused, num_actions=A)


# ----------------------------------------------------------------------------
# Params / reference
# ----------------------------------------------------------------------------
def init_params(key, in_features, features=32, hidden=256, action_dim=8):
    """PyTorch-style uniform(+/- 1/sqrt(fan_in)) init; weights stored (fan_in, fan_out)."""
    def linear(k, fan_in, fan_out):
        kw, kb = jax.random.split(k)
        bound = 1.0 / jnp.sqrt(jnp.float32(fan_in))
        w = jax.random.uniform(kw, (fan_in, fan_out), jnp.float32, -bound, bound)
        b = jax.random.uniform(kb, (1, fan_out), jnp.float32, -bound, bound)
        return w, b

    k_emb, k1, k2, k3 = jax.random.split(key, 4)
    we, be = linear(k_emb, in_features, features)
    w1, b1 = linear(k1, action_dim, hidden)
    w2, b2 = linear(k2, hidden, hidden)
    w3, b3 = linear(k3, hidden, features)
    return dict(we=we, be=be, w1=w1, b1=b1, w2=w2, b2=b2, w3=w3, b3=b3)


def reference_forward(player_emb, actions, p):
    """Pure-JAX reference of the PyTorch forward."""
    pe = player_emb @ p["we"] + p["be"]
    h = jnp.maximum(actions @ p["w1"] + p["b1"], 0.0)
    h = jnp.maximum(h @ p["w2"] + p["b2"], 0.0)
    ae = h @ p["w3"] + p["b3"]
    return jnp.einsum("ad,bd->ba", ae, pe)


if __name__ == "__main__":
    key = jax.random.PRNGKey(0)
    k_pe, k_act, k_params = jax.random.split(key, 3)

    B = 8             # batch of player embeddings
    IN_FEATURES = 32  # player embedding width
    FEATURES = 32     # projection width ("features" arg)
    A = 16            # number of discrete actions in the (synthetic) lookup table
    ACTION_DIM = 8    # each action is an 8-dim control vector

    player_emb = jax.random.normal(k_pe, (B, IN_FEATURES), jnp.float32)
    actions = jax.random.uniform(k_act, (A, ACTION_DIM), jnp.float32, -1.0, 1.0)
    params = init_params(k_params, IN_FEATURES, features=FEATURES,
                         hidden=256, action_dim=ACTION_DIM)

    ref = reference_forward(player_emb, actions, params)

    # f32 path: exact-semantics check against the pure-JAX reference.
    wf32, bf32 = precompute_fused_weights(actions, params, param_dtype=jnp.float32)
    out_f32 = controls_predictor_dot(player_emb, wf32, bf32, num_actions=A)
    out_f32 = jax.block_until_ready(out_f32)
    assert out_f32.shape == (B, A)
    assert jnp.allclose(out_f32, ref, atol=1e-4, rtol=1e-4), "f32 mismatch vs reference"

    # bf16 hot path: bf16 fused weights + bf16 player_emb stream, f32 accumulation.
    w_fused, b_fused = precompute_fused_weights(actions, params)   # bf16 default
    (w_fused, b_fused) = jax.block_until_ready((w_fused, b_fused))
    out = controls_predictor_dot(player_emb.astype(jnp.bfloat16),
                                 w_fused, b_fused, num_actions=A)
    out = jax.block_until_ready(out)
    assert out.shape == (B, A)
    assert jnp.allclose(out, ref, atol=2e-2, rtol=2e-2), "bf16 mismatch vs reference"

    print("KERNEL_OK")
</pallas_src>

<mosaic_0001>
module attributes {stable_mosaic.version = 11 : i64} {
  func.func @_fused_weight_kernel(%arg0: memref<128x8xf32, #tpu.memory_space<vmem>>, %arg1: memref<8x256xf32, #tpu.memory_space<vmem>>, %arg2: memref<1x256xf32, #tpu.memory_space<vmem>>, %arg3: memref<256x256xf32, #tpu.memory_space<vmem>>, %arg4: memref<1x256xf32, #tpu.memory_space<vmem>>, %arg5: memref<256x32xf32, #tpu.memory_space<vmem>>, %arg6: memref<1x32xf32, #tpu.memory_space<vmem>>, %arg7: memref<32x32xf32, #tpu.memory_space<vmem>>, %arg8: memref<1x32xf32, #tpu.memory_space<vmem>>, %arg9: memref<32x128xf32, #tpu.memory_space<vmem>>, %arg10: memref<1x128xf32, #tpu.memory_space<vmem>>) attributes {dimension_semantics = [], scalar_prefetch = 0 : i64, scratch_operands = 0 : i64, tpu.core_type = #tpu.core_type<tc>} {
    %c0 = arith.constant 0 : index
    %c0_0 = arith.constant 0 : index
    %0 = vector.load %arg0[%c0, %c0_0] : memref<128x8xf32, #tpu.memory_space<vmem>>, vector<128x8xf32>
    %c0_1 = arith.constant 0 : index
    %c0_2 = arith.constant 0 : index
    %1 = vector.load %arg1[%c0_1, %c0_2] : memref<8x256xf32, #tpu.memory_space<vmem>>, vector<8x256xf32>
    %cst = arith.constant dense<0.000000e+00> : vector<128x256xf32>
    %2 = tpu.matmul %0, %1, %cst {dimension_numbers = #tpu.dot_dimension_numbers<[1], [0], [0], [1], [0, 0, 1, 1], [], []>} : vector<128x8xf32>, vector<8x256xf32>, vector<128x256xf32> -> vector<128x256xf32>
    %c0_3 = arith.constant 0 : index
    %c0_4 = arith.constant 0 : index
    %3 = vector.load %arg2[%c0_3, %c0_4] : memref<1x256xf32, #tpu.memory_space<vmem>>, vector<1x256xf32>
    %4 = vector.broadcast %3 : vector<1x256xf32> to vector<128x256xf32>
    %5 = arith.addf %2, %4 : vector<128x256xf32>
    %cst_5 = arith.constant 0.000000e+00 : f32
    %6 = vector.broadcast %cst_5 : f32 to vector<128x256xf32>
    %7 = arith.maximumf %5, %6 : vector<128x256xf32>
    %c0_6 = arith.constant 0 : index
    %c0_7 = arith.constant 0 : index
    %8 = vector.load %arg3[%c0_6, %c0_7] : memref<256x256xf32, #tpu.memory_space<vmem>>, vector<256x256xf32>
    %cst_8 = arith.constant dense<0.000000e+00> : vector<128x256xf32>
    %9 = tpu.matmul %7, %8, %cst_8 {dimension_numbers = #tpu.dot_dimension_numbers<[1], [0], [0], [1], [0, 0, 1, 1], [], []>} : vector<128x256xf32>, vector<256x256xf32>, vector<128x256xf32> -> vector<128x256xf32>
    %c0_9 = arith.constant 0 : index
    %c0_10 = arith.constant 0 : index
    %10 = vector.load %arg4[%c0_9, %c0_10] : memref<1x256xf32, #tpu.memory_space<vmem>>, vector<1x256xf32>
    %11 = vector.broadcast %10 : vector<1x256xf32> to vector<128x256xf32>
    %12 = arith.addf %9, %11 : vector<128x256xf32>
    %cst_11 = arith.constant 0.000000e+00 : f32
    %13 = vector.broadcast %cst_11 : f32 to vector<128x256xf32>
    %14 = arith.maximumf %12, %13 : vector<128x256xf32>
    %c0_12 = arith.constant 0 : index
    %c0_13 = arith.constant 0 : index
    %15 = vector.load %arg5[%c0_12, %c0_13] : memref<256x32xf32, #tpu.memory_space<vmem>>, vector<256x32xf32>
    %cst_14 = arith.constant dense<0.000000e+00> : vector<128x32xf32>
    %16 = tpu.matmul %14, %15, %cst_14 {dimension_numbers = #tpu.dot_dimension_numbers<[1], [0], [0], [1], [0, 0, 1, 1], [], []>} : vector<128x256xf32>, vector<256x32xf32>, vector<128x32xf32> -> vector<128x32xf32>
    %c0_15 = arith.constant 0 : index
    %c0_16 = arith.constant 0 : index
    %17 = vector.load %arg6[%c0_15, %c0_16] : memref<1x32xf32, #tpu.memory_space<vmem>>, vector<1x32xf32>
    %18 = vector.broadcast %17 : vector<1x32xf32> to vector<128x32xf32>
    %19 = arith.addf %16, %18 : vector<128x32xf32>
    %c0_17 = arith.constant 0 : index
    %c0_18 = arith.constant 0 : index
    %20 = vector.load %arg7[%c0_17, %c0_18] : memref<32x32xf32, #tpu.memory_space<vmem>>, vector<32x32xf32>
    %cst_19 = arith.constant dense<0.000000e+00> : vector<32x128xf32>
    %21 = tpu.matmul %20, %19, %cst_19 {dimension_numbers = #tpu.dot_dimension_numbers<[1], [1], [0], [0], [0, 0, 1, 0], [], []>} : vector<32x32xf32>, vector<128x32xf32>, vector<32x128xf32> -> vector<32x128xf32>
    %c0_20 = arith.constant 0 : index
    %c0_21 = arith.constant 0 : index
    %22 = vector.load %arg8[%c0_20, %c0_21] : memref<1x32xf32, #tpu.memory_space<vmem>>, vector<1x32xf32>
    %cst_22 = arith.constant dense<0.000000e+00> : vector<1x128xf32>
    %23 = tpu.matmul %22, %19, %cst_22 {dimension_numbers = #tpu.dot_dimension_numbers<[1], [1], [0], [0], [0, 0, 1, 0], [], []>} : vector<1x32xf32>, vector<128x32xf32>, vector<1x128xf32> -> vector<1x128xf32>
    %c0_23 = arith.constant 0 : index
    %c0_24 = arith.constant 0 : index
    %24 = vector.load %arg9[%c0_23, %c0_24] : memref<32x128xf32, #tpu.memory_space<vmem>>, vector<32x128xf32>
    tpu.vector_store %arg9[%c0_23, %c0_24], %21 {strides = array<i32>} : memref<32x128xf32, #tpu.memory_space<vmem>>, vector<32x128xf32>,
    %c0_25 = arith.constant 0 : index
    %c0_26 = arith.constant 0 : index
    %25 = vector.load %arg10[%c0_25, %c0_26] : memref<1x128xf32, #tpu.memory_space<vmem>>, vector<1x128xf32>
    tpu.vector_store %arg10[%c0_25, %c0_26], %23 {strides = array<i32>} : memref<1x128xf32, #tpu.memory_space<vmem>>, vector<1x128xf32>,
    return
  }
}

</mosaic_0001>

<bundles_post_ra>
// kernel: tpu_custom_call.1
= control target key start
LH: loop header
LB: loop body
LE: loop exit
PB: predicated region body
PF: predicated region fallthrough
CT: control target
= control target key end

     0   :  { %16 = vsyncpa [#allocation3], 0  ;;  %s2014_s0 = inlined_call_operand.vmem [shape: f32[128,8], index: 0, kind: input, shape index: {}]   ;;  %s2015_s1 = inlined_call_operand.vmem [shape: f32[8,256], index: 1, kind: input, shape index: {}]   ;;  %s2016_s2 = inlined_call_operand.vmem [shape: f32[1,256], index: 2, kind: input, shape index: {}]   ;;  %s2017_s3 = inlined_call_operand.hbm [shape: f32[256,256], index: 3, kind: input, shape index: {}]   ;;  %s2018_s4 = inlined_call_operand.vmem [shape: f32[1,256], index: 4, kind: input, shape index: {}]   ;;  %s2019_s5 = inlined_call_operand.vmem [shape: f32[256,32], index: 5, kind: input, shape index: {}]   ;;  %s2020_s6 = inlined_call_operand.vmem [shape: f32[1,32], index: 6, kind: input, shape index: {}]   ;;  %s2021_s7 = inlined_call_operand.vmem [shape: f32[32,32], index: 7, kind: input, shape index: {}]   ;;  %s2022_s8 = inlined_call_operand.vmem [shape: f32[1,32], index: 8, kind: input, shape index: {}]   ;;  %s2023_s9 = inlined_call_operand.hbm [shape: f32[32,128], index: 9, kind: output, shape index: {0}]   ;;  %s2024_s10 = inlined_call_operand.hbm [shape: f32[1,128], index: 10, kind: output, shape index: {1}]  }
   0x1   :  { %17 = vsyncpa [#allocation4], 0 }
   0x2   :  { %18 = vsyncpa [#allocation7], 0  ;;  %s1537_s13 = smov [#allocation2]   ;;  %s1465_s17 = scalar_lea.hbm %s2017_s3, 8192 }
   0x3   :  { %s30_s14 = sshll.u32 %s1537_s13, 4  ;;  %p1466_p0 = scmp.ne.s32.totalorder %s2017_s3, %s1465_s17  ;;  %s31_s14 = int_to_ptr.vmem [resolvable:$true] %s30_s14 }
   0x4   :  { %p1469_p1 = scmp.lt.u32.totalorder %s1465_s17, %s2017_s3 }
   0x6   :  { %p1471_p2 = pnand %p1469_p1, %p1466_p0 }
   0x8   :  { %1474 = shalt.err (!%p1471_p2)
}
   0x9   :  { %s1475_s22 = scalar_lea.vmem %s31_s14, 8192  ;;  %p1480_p4 = scmp.lt.s32.totalorder %s31_s14, %s31_s14 }
   0xa   :  { %p1476_p3 = scmp.ne.s32.totalorder %s31_s14, %s1475_s22  ;;  %p1481_p5 = scmp.lt.s32.totalorder %s1475_s22, %s1475_s22 }
   0xc   :  { %p1482_p6 = por %p1481_p5, %p1480_p4 }
   0xe   :  { %p1483_p7 = pnand %p1482_p6, %p1476_p3 }
  0x10   :  { %1486 = shalt.err (!%p1483_p7)
}
  0x11   :  { %s1538_s23 = smov 256   ;;  %s1539_s24 = smov 16  }
  0x12   :  { %36 = dma.hbm_to_vmem [thread:$0]  %s2017_s3, 8192, %s31_s14, [#allocation3], %s1538_s23, %s1538_s23, %s1539_s24  }
  0x13   :  { %1531 = dma.done.wait [#allocation3], 8192  }
  0x14   :  { %1532 = vsyncadd [#allocation3], 4294959104  ;;  %v1540_v0 = vmov 0.0   ;;  %v67_v1 = vld [vmem:[%s2015_s1 + $0x8] sm:$0xff]  ;;  %v66_v2 = vld [vmem:[%s2015_s1] sm:$0xff]  ;;  %vm80_vm0 = vcmask 64512  }
  0x15   :  { %193 = vmatprep.mubr.f32.mxu0 %v1540_v0  ;;  %v50_v3 = vld [vmem:[%s2014_s0] sm:$0xff]  ;;  %129 = vmatprep.subr.mxu0 %v67_v1  ;;  %v51_v4 = vld [vmem:[%s2014_s0 + $0x8] sm:$0xff]  ;;  %v52_v5 = vld [vmem:[%s2014_s0 + $0x10] sm:$0xff]  ;;  %vm779_vm1 = vcmask 261120   ;;  %vm1542_vm2 = vmmov 0   ;;  %s1544_s26 = smov [#allocation5]  }
  0x16   :  { %130 = vmatpush1.msra.mxu0 %v66_v2  ;;  %v323_v6 = vld [vmem:[#allocation2 + $0x8] sm:$0xff]  ;;  %v325_v7 = vld [vmem:[#allocation2 + $0x18] sm:$0xff]  ;;  %v322_v8 = vld [vmem:[#allocation2] sm:$0xff]  ;;  %s1009_s27 = sshll.u32 %s1544_s26, 4  ;;  %s1010_s27 = int_to_ptr.vmem [resolvable:$true] %s1009_s27 }
  0x17   :  { %1035 = vmatmul.mubr.msk.f32.vlgmr.msra.gmra.mrb[0].mxu0 %vm80_vm0, %v50_v3  ;;  %v1279_v9 = vpack.c.bf16 %v325_v7, %v323_v6  ;;  %v324_v10 = vld [vmem:[#allocation2 + $0x10] sm:$0xff]  ;;  %v327_v11 = vld [vmem:[#allocation2 + $0x28] sm:$0xff]  ;;  %v329_v12 = vld [vmem:[#allocation2 + $0x38] sm:$0xff] }
  0x18   :  { %199 = vmatprep.mubr.f32.mxu0 %v1540_v0  ;;  %v1281_v13 = vpack.c.bf16 %v324_v10, %v322_v8  ;;  %v1283_v14 = vpack.c.bf16 %v329_v12, %v327_v11  ;;  %v326_v15 = vld [vmem:[#allocation2 + $0x20] sm:$0xff]  ;;  %v328_v16 = vld [vmem:[#allocation2 + $0x30] sm:$0xff]  ;;  %v331_v17 = vld [vmem:[#allocation2 + $0x48] sm:$0xff] }
  0x19   :  { %1280 = vmatprep.subr.bf16.mxu1 %v1279_v9  ;;  %v333_v18 = vld [vmem:[#allocation2 + $0x58] sm:$0xff]  ;;  %v1285_v19 = vpack.c.bf16 %v328_v16, %v326_v15  ;;  %v330_v21 = vld [vmem:[#allocation2 + $0x40] sm:$0xff]  ;;  %v332_v22 = vld [vmem:[#allocation2 + $0x50] sm:$0xff] }
  0x1a   :  { %1282 = vmatpush1.bf16.msra.mxu1 %v1281_v13  ;;  %v1287_v20 = vpack.c.bf16 %v333_v18, %v331_v17  ;;  %v53_v23 = vld [vmem:[%s2014_s0 + $0x18] sm:$0xff]  ;;  %v335_v24 = vld [vmem:[#allocation2 + $0x68] sm:$0xff]  ;;  %v1289_v26 = vpack.c.bf16 %v332_v22, %v330_v21  ;;  %v334_v28 = vld [vmem:[#allocation2 + $0x60] sm:$0xff] }
  0x1b   :  { %1036 = vmatmul.mubr.msk.f32.gmra.mrb[2].mxu0 %vm80_vm0, %v51_v4  ;;  %1284 = vmatprep.subr.bf16.mxu1 %v1283_v14  ;;  %v337_v25 = vld [vmem:[#allocation2 + $0x78] sm:$0xff]  ;;  %v336_v29 = vld [vmem:[#allocation2 + $0x70] sm:$0xff]  ;;  %v54_v30 = vld [vmem:[%s2014_s0 + $0x20] sm:$0xff] }
  0x1c   :  { %205 = vmatprep.mubr.f32.mxu0 %v1540_v0  ;;  %v1291_v27 = vpack.c.bf16 %v337_v25, %v335_v24  ;;  %v339_v31 = vld [vmem:[#allocation2 + $0x88] sm:$0xff]  ;;  %v341_v32 = vld [vmem:[#allocation2 + $0x98] sm:$0xff]  ;;  %v1293_v33 = vpack.c.bf16 %v336_v29, %v334_v28  ;;  %v338_v35 = vld [vmem:[#allocation2 + $0x80] sm:$0xff] }
  0x1d   :  { %v1295_v34 = vpack.c.bf16 %v341_v32, %v339_v31  ;;  %v340_v36 = vld [vmem:[#allocation2 + $0x90] sm:$0xff]  ;;  %v55_v37 = vld [vmem:[%s2014_s0 + $0x28] sm:$0xff]  ;;  %v345_v39 = vld [vmem:[#allocation2 + $0xb8] sm:$0xff] }
  0x1e   :  { %1286 = vmatpush1.bf16.msra.mxu1 %v1285_v19  ;;  %v343_v38 = vld [vmem:[#allocation2 + $0xa8] sm:$0xff]  ;;  %v1297_v40 = vpack.c.bf16 %v340_v36, %v338_v35  ;;  %v342_v42 = vld [vmem:[#allocation2 + $0xa0] sm:$0xff]  ;;  %v344_v43 = vld [vmem:[#allocation2 + $0xb0] sm:$0xff] }
  0x1f   :  { %1037 = vmatmul.mubr.msk.f32.gmra.mrb[4].mxu0 %vm80_vm0, %v52_v5  ;;  %1288 = vmatprep.subr.bf16.mxu1 %v1287_v20  ;;  %v1299_v41 = vpack.c.bf16 %v345_v39, %v343_v38  ;;  %v56_v44 = vld [vmem:[%s2014_s0 + $0x30] sm:$0xff]  ;;  %v347_v45 = vld [vmem:[#allocation2 + $0xc8] sm:$0xff]  ;;  %v349_v46 = vld [vmem:[#allocation2 + $0xd8] sm:$0xff]  ;;  %v1301_v47 = vpack.c.bf16 %v344_v43, %v342_v42 }
  0x20   :  { %211 = vmatprep.mubr.f32.mxu0 %v1540_v0  ;;  %v1303_v48 = vpack.c.bf16 %v349_v46, %v347_v45  ;;  %v346_v49 = vld [vmem:[#allocation2 + $0xc0] sm:$0xff]  ;;  %v348_v50 = vld [vmem:[#allocation2 + $0xd0] sm:$0xff]  ;;  %v57_v51 = vld [vmem:[%s2014_s0 + $0x38] sm:$0xff] }
  0x21   :  { %v351_v52 = vld [vmem:[#allocation2 + $0xe8] sm:$0xff]  ;;  %v353_v53 = vld [vmem:[#allocation2 + $0xf8] sm:$0xff]  ;;  %v1305_v54 = vpack.c.bf16 %v348_v50, %v346_v49  ;;  %v350_v56 = vld [vmem:[#allocation2 + $0xe0] sm:$0xff] }
  0x22   :  { %1290 = vmatpush1.bf16.msra.mxu1 %v1289_v26  ;;  %v1307_v55 = vpack.c.bf16 %v353_v53, %v351_v52  ;;  %v352_v57 = vld [vmem:[#allocation2 + $0xf0] sm:$0xff]  ;;  %v58_v58 = vld [vmem:[%s2014_s0 + $0x40] sm:$0xff]  ;;  %v355_v59 = vld [vmem:[#allocation2 + $0x108] sm:$0xff] }
  0x23   :  { %1038 = vmatmul.mubr.msk.f32.gmra.mrb[6].mxu0 %vm80_vm0, %v53_v23  ;;  %1292 = vmatprep.subr.bf16.mxu1 %v1291_v27  ;;  %v357_v60 = vld [vmem:[#allocation2 + $0x118] sm:$0xff]  ;;  %v1309_v61 = vpack.c.bf16 %v352_v57, %v350_v56  ;;  %v354_v63 = vld [vmem:[#allocation2 + $0x100] sm:$0xff]  ;;  %v356_v1 = vld [vmem:[#allocation2 + $0x110] sm:$0xff] }
  0x24   :  { %217 = vmatprep.mubr.f32.mxu0 %v1540_v0  ;;  %v1311_v62 = vpack.c.bf16 %v357_v60, %v355_v59  ;;  %v59_v2 = vld [vmem:[%s2014_s0 + $0x48] sm:$0xff]  ;;  %v361_v4 = vld [vmem:[#allocation2 + $0x138] sm:$0xff]  ;;  %v1313_v5 = vpack.c.bf16 %v356_v1, %v354_v63  ;;  %v358_v7 = vld [vmem:[#allocation2 + $0x120] sm:$0xff] }
  0x25   :  { %v359_v3 = vld [vmem:[#allocation2 + $0x128] sm:$0xff]  ;;  %v360_v8 = vld [vmem:[#allocation2 + $0x130] sm:$0xff]  ;;  %v365_v11 = vld [vmem:[#allocation2 + $0x158] sm:$0xff] }
  0x26   :  { %1294 = vmatpush1.bf16.msra.mxu1 %v1293_v33  ;;  %v1315_v6 = vpack.c.bf16 %v361_v4, %v359_v3  ;;  %v60_v9 = vld [vmem:[%s2014_s0 + $0x50] sm:$0xff]  ;;  %v363_v10 = vld [vmem:[#allocation2 + $0x148] sm:$0xff]  ;;  %v1317_v12 = vpack.c.bf16 %v360_v8, %v358_v7  ;;  %v362_v14 = vld [vmem:[#allocation2 + $0x140] sm:$0xff] }
  0x27   :  { %1039 = vmatmul.mubr.msk.f32.gmra.mrb[8].mxu0 %vm80_vm0, %v54_v30  ;;  %1296 = vmatprep.subr.bf16.mxu1 %v1295_v34  ;;  %v1319_v13 = vpack.c.bf16 %v365_v11, %v363_v10  ;;  %v364_v15 = vld [vmem:[#allocation2 + $0x150] sm:$0xff]  ;;  %v61_v16 = vld [vmem:[%s2014_s0 + $0x58] sm:$0xff]  ;;  %v367_v17 = vld [vmem:[#allocation2 + $0x168] sm:$0xff] }
  0x28   :  { %223 = vmatprep.mubr.f32.mxu0 %v1540_v0  ;;  %v369_v18 = vld [vmem:[#allocation2 + $0x178] sm:$0xff]  ;;  %v1321_v19 = vpack.c.bf16 %v364_v15, %v362_v14  ;;  %v366_v21 = vld [vmem:[#allocation2 + $0x160] sm:$0xff]  ;;  %v368_v22 = vld [vmem:[#allocation2 + $0x170] sm:$0xff] }
  0x29   :  { %v1323_v20 = vpack.c.bf16 %v369_v18, %v367_v17  ;;  %v62_v23 = vld [vmem:[%s2014_s0 + $0x60] sm:$0xff]  ;;  %v371_v24 = vld [vmem:[#allocation2 + $0x188] sm:$0xff]  ;;  %v373_v25 = vld [vmem:[#allocation2 + $0x198] sm:$0xff]  ;;  %v1325_v26 = vpack.c.bf16 %v368_v22, %v366_v21 }
  0x2a   :  { %1298 = vmatpush1.bf16.msra.mxu1 %v1297_v40  ;;  %v1327_v27 = vpack.c.bf16 %v373_v25, %v371_v24  ;;  %v370_v28 = vld [vmem:[#allocation2 + $0x180] sm:$0xff]  ;;  %v372_v29 = vld [vmem:[#allocation2 + $0x190] sm:$0xff]  ;;  %v63_v30 = vld [vmem:[%s2014_s0 + $0x68] sm:$0xff] }
  0x2b   :  { %1040 = vmatmul.mubr.msk.f32.gmra.mrb[10].mxu0 %vm80_vm0, %v55_v37  ;;  %1300 = vmatprep.subr.bf16.mxu1 %v1299_v41  ;;  %v375_v31 = vld [vmem:[#allocation2 + $0x1a8] sm:$0xff]  ;;  %v377_v32 = vld [vmem:[#allocation2 + $0x1b8] sm:$0xff]  ;;  %v1329_v33 = vpack.c.bf16 %v372_v29, %v370_v28  ;;  %v374_v35 = vld [vmem:[#allocation2 + $0x1a0] sm:$0xff] }
  0x2c   :  { %229 = vmatprep.mubr.f32.mxu0 %v1540_v0  ;;  %v1331_v34 = vpack.c.bf16 %v377_v32, %v375_v31  ;;  %v376_v36 = vld [vmem:[#allocation2 + $0x1b0] sm:$0xff]  ;;  %v379_v38 = vld [vmem:[#allocation2 + $0x1c8] sm:$0xff]  ;;  %v381_v39 = vld [vmem:[#allocation2 + $0x1d8] sm:$0xff] }
  0x2d   :  { %v64_v37 = vld [vmem:[%s2014_s0 + $0x70] sm:$0xff]  ;;  %v1333_v40 = vpack.c.bf16 %v376_v36, %v374_v35  ;;  %v1335_v41 = vpack.c.bf16 %v381_v39, %v379_v38  ;;  %v65_v42 = vld [vmem:[%s2014_s0 + $0x78] sm:$0xff]  ;;  %v378_v43 = vld [vmem:[#allocation2 + $0x1c0] sm:$0xff] }
  0x2e   :  { %1302 = vmatpush1.bf16.msra.mxu1 %v1301_v47  ;;  %v383_v46 = vld [vmem:[#allocation2 + $0x1e8] sm:$0xff]  ;;  %v385_v47 = vld [vmem:[#allocation2 + $0x1f8] sm:$0xff]  ;;  %v382_v49 = vld [vmem:[#allocation2 + $0x1e0] sm:$0xff] }
  0x2f   :  { %1041 = vmatmul.mubr.msk.f32.gmra.mrb[12].mxu0 %vm80_vm0, %v56_v44  ;;  %1304 = vmatprep.subr.bf16.mxu1 %v1303_v48  ;;  %v380_v44 = vld [vmem:[#allocation2 + $0x1d0] sm:$0xff]  ;;  %v1339_v48 = vpack.c.bf16 %v385_v47, %v383_v46  ;;  %v607_v52 = vld [vmem:[%s2019_s5 + $0x80] sm:$0xff]  ;;  %v608_v53 = vld [vmem:[%s2019_s5 + $0x88] sm:$0xff] }
  0x30   :  { %235 = vmatprep.mubr.f32.mxu0 %v1540_v0  ;;  %v1337_v45 = vpack.c.bf16 %v380_v44, %v378_v43  ;;  %v384_v50 = vld [vmem:[#allocation2 + $0x1f0] sm:$0xff]  ;;  %v592_v56 = vld [vmem:[%s2019_s5 + $0x8] sm:$0xff]  ;;  %v611_v63 = vld [vmem:[%s2019_s5 + $0xa0] sm:$0xff] }
  0x31   :  { %v609_v57 = vld [vmem:[%s2019_s5 + $0x90] sm:$0xff]  ;;  %v612_v1 = vld [vmem:[%s2019_s5 + $0xa8] sm:$0xff]  ;;  %v595_v4 = vld [vmem:[%s2019_s5 + $0x20] sm:$0xff] }
  0x32   :  { %1306 = vmatpush1.bf16.msra.mxu1 %v1305_v54  ;;  %v591_v54 = vld [vmem:[%s2019_s5] sm:$0xff]  ;;  %v1351_v3 = vpack.c.bf16 %v612_v1, %v611_v63  ;;  %v614_v7 = vld [vmem:[%s2019_s5 + $0xb8] sm:$0xff]  ;;  %v597_v10 = vld [vmem:[%s2019_s5 + $0x30] sm:$0xff] }
  0x33   :  { %1042 = vmatmul.mubr.msk.f32.gmra.mrb[14].mxu0 %vm80_vm0, %v57_v51  ;;  %1308 = vmatprep.subr.bf16.mxu1 %v1307_v55  ;;  %v1341_v51 = vpack.c.bf16 %v384_v50, %v382_v49  ;;  %v1343_v55 = vpack.c.bf16 %v608_v53, %v607_v52  ;;  %v1345_v59 = vpack.c.bf16 %v592_v56, %v591_v54  ;;  %v598_v11 = vld [vmem:[%s2019_s5 + $0x38] sm:$0xff]  ;;  %v600_v17 = vld [vmem:[%s2019_s5 + $0x48] sm:$0xff]  ;;  %v617_v18 = vld [vmem:[%s2019_s5 + $0xd0] sm:$0xff] }
  0x34   :  { %241 = vmatprep.mubr.f32.mxu0 %v1540_v0  ;;  %v1357_v14 = vpack.c.bf16 %v598_v11, %v597_v10  ;;  %v601_v22 = vld [vmem:[%s2019_s5 + $0x50] sm:$0xff]  ;;  %v619_v24 = vld [vmem:[%s2019_s5 + $0xe0] sm:$0xff]  ;;  %v620_v25 = vld [vmem:[%s2019_s5 + $0xe8] sm:$0xff] }
  0x35   :  { %1344 = vmatprep.subr.bf16.mxu0 %v1343_v55  ;;  %v603_v28 = vld [vmem:[%s2019_s5 + $0x60] sm:$0xff]  ;;  %v604_v29 = vld [vmem:[%s2019_s5 + $0x68] sm:$0xff]  ;;  %v622_v31 = vld [vmem:[%s2019_s5 + $0xf8] sm:$0xff] }
  0x36   :  { %1310 = vmatpush1.bf16.msra.mxu1 %v1309_v61  ;;  %v593_v61 = vld [vmem:[%s2019_s5 + $0x10] sm:$0xff]  ;;  %1346 = vmatpush3.bf16.msra.mxu0 %v1345_v59  ;;  %v1369_v32 = vpack.c.bf16 %v604_v29, %v603_v28  ;;  %vm1901_vm3 = vmpackc.low %vm779_vm1, %vm779_vm1 }
  0x37   :  { %1043 = vmatmul.mubr.msk.f32.gmra.mrb[16].mxu0 %vm80_vm0, %v58_v58  ;;  %1312 = vmatprep.subr.bf16.mxu1 %v1311_v62  ;;  %v610_v58 = vld [vmem:[%s2019_s5 + $0x98] sm:$0xff] }
  0x38   :  { %247 = vmatprep.mubr.f32.mxu0 %v1540_v0  ;;  %v1347_v60 = vpack.c.bf16 %v610_v58, %v609_v57  ;;  %v594_v62 = vld [vmem:[%s2019_s5 + $0x18] sm:$0xff] }
  0x3a   :  { %1314 = vmatpush1.bf16.msra.mxu1 %v1313_v5  ;;  %1348 = vmatprep.subr.bf16.mxu0 %v1347_v60  ;;  %v596_v5 = vld [vmem:[%s2019_s5 + $0x28] sm:$0xff] }
  0x3b   :  { %1044 = vmatmul.mubr.msk.f32.gmra.mrb[18].mxu0 %vm80_vm0, %v59_v2  ;;  %1316 = vmatprep.subr.bf16.mxu1 %v1315_v6  ;;  %v1349_v2 = vpack.c.bf16 %v594_v62, %v593_v61  ;;  %v613_v6 = vld [vmem:[%s2019_s5 + $0xb0] sm:$0xff]  ;;  %v1353_v8 = vpack.c.bf16 %v596_v5, %v595_v4 }
  0x3c   :  { %253 = vmatprep.mubr.f32.mxu0 %v1540_v0 }
  0x3d   :  { %1350 = vmatpush3.bf16.msra.mxu0 %v1349_v2 }
  0x3e   :  { %1318 = vmatpush1.bf16.msra.mxu1 %v1317_v12  ;;  %1352 = vmatprep.subr.bf16.mxu0 %v1351_v3  ;;  %v615_v12 = vld [vmem:[%s2019_s5 + $0xc0] sm:$0xff] }
  0x3f   :  { %1045 = vmatmul.mubr.msk.f32.gmra.mrb[20].mxu0 %vm80_vm0, %v60_v9  ;;  %1320 = vmatprep.subr.bf16.mxu1 %v1319_v13  ;;  %v1355_v9 = vpack.c.bf16 %v614_v7, %v613_v6  ;;  %v616_v13 = vld [vmem:[%s2019_s5 + $0xc8] sm:$0xff] }
  0x40   :  { %259 = vmatprep.mubr.f32.mxu0 %v1540_v0  ;;  %v1359_v15 = vpack.c.bf16 %v616_v13, %v615_v12 }
  0x41   :  { %1354 = vmatpush3.bf16.msra.mxu0 %v1353_v8 }
  0x42   :  { %1322 = vmatpush1.bf16.msra.mxu1 %v1321_v19  ;;  %1356 = vmatprep.subr.bf16.mxu0 %v1355_v9  ;;  %v618_v19 = vld [vmem:[%s2019_s5 + $0xd8] sm:$0xff] }
  0x43   :  { %1046 = vmatmul.mubr.msk.f32.gmra.mrb[22].mxu0 %vm80_vm0, %v61_v16  ;;  %1324 = vmatprep.subr.bf16.mxu1 %v1323_v20  ;;  %v599_v16 = vld [vmem:[%s2019_s5 + $0x40] sm:$0xff]  ;;  %v1363_v21 = vpack.c.bf16 %v618_v19, %v617_v18 }
  0x44   :  { %265 = vmatprep.mubr.f32.mxu0 %v1540_v0  ;;  %v1361_v20 = vpack.c.bf16 %v600_v17, %v599_v16 }
  0x45   :  { %1358 = vmatpush3.bf16.msra.mxu0 %v1357_v14 }
  0x46   :  { %1326 = vmatpush1.bf16.msra.mxu1 %v1325_v26  ;;  %1360 = vmatprep.subr.bf16.mxu0 %v1359_v15 }
  0x47   :  { %1047 = vmatmul.mubr.msk.f32.gmra.mrb[24].mxu0 %vm80_vm0, %v62_v23  ;;  %1328 = vmatprep.subr.bf16.mxu1 %v1327_v27  ;;  %v602_v23 = vld [vmem:[%s2019_s5 + $0x58] sm:$0xff]  ;;  %v1367_v27 = vpack.c.bf16 %v620_v25, %v619_v24 }
  0x48   :  { %271 = vmatprep.mubr.f32.mxu0 %v1540_v0  ;;  %v1365_v26 = vpack.c.bf16 %v602_v23, %v601_v22 }
  0x49   :  { %1362 = vmatpush3.bf16.msra.mxu0 %v1361_v20 }
  0x4a   :  { %1330 = vmatpush1.bf16.msra.mxu1 %v1329_v33  ;;  %1364 = vmatprep.subr.bf16.mxu0 %v1363_v21 }
  0x4b   :  { %1048 = vmatmul.mubr.msk.f32.gmra.mrb[26].mxu0 %vm80_vm0, %v63_v30  ;;  %1332 = vmatprep.subr.bf16.mxu1 %v1331_v34  ;;  %v621_v30 = vld [vmem:[%s2019_s5 + $0xf0] sm:$0xff]  ;;  %v70_v34 = vlaneseq }
  0x4c   :  { %277 = vmatprep.mubr.f32.mxu0 %v1540_v0  ;;  %v1371_v33 = vpack.c.bf16 %v622_v31, %v621_v30 }
  0x4d   :  { %1366 = vmatpush3.bf16.msra.mxu0 %v1365_v26  ;;  %v1790_v35 = vshrl.u32 %v70_v34, 7 }
  0x4e   :  { %1334 = vmatpush1.bf16.msra.mxu1 %v1333_v40  ;;  %1368 = vmatprep.subr.bf16.mxu0 %v1367_v27 }
  0x4f   :  { %1049 = vmatmul.mubr.msk.f32.gmra.mrb[28].mxu0 %vm80_vm0, %v64_v37  ;;  %1336 = vmatprep.subr.bf16.mxu1 %v1335_v41  ;;  %v72_v36 = vsub.s32 0, %v1790_v35  ;;  %v68_v37 = vld [vmem:[%s2016_s2] sm:$0x3]  ;;  %v76_v38 = vsub.s32 1, %v1790_v35 }
  0x50   :  { %283 = vmatprep.mubr.f32.mxu0 %v1540_v0 }
  0x51   :  { %1370 = vmatpush3.bf16.msra.mxu0 %v1369_v32  ;;  %v1799_v39 = vrot.slane %v68_v37, %v72_v36  ;;  %v1803_v40 = vrot.slane %v68_v37, %v76_v38 }
  0x52   :  { %1338 = vmatpush1.bf16.msra.mxu1 %v1337_v45  ;;  %1372 = vmatprep.subr.bf16.mxu0 %v1371_v33 }
  0x53   :  { %1050 = vmatmul.mubr.msk.f32.gmra.mrb[30].mxu0 %vm80_vm0, %v65_v42  ;;  %1340 = vmatprep.subr.bf16.mxu1 %v1339_v48 }
  0x56   :  { %1342 = vmatpush1.bf16.msra.mxu1 %v1341_v51 }
  0xea   :  { %v195_v41 = vpop.f32.mrb[0].mxu0 }
  0xeb   :  { %v196_v42 = vadd.f32 %v195_v41, %v1799_v39  ;;  %v197_v43 = vpop.f32.mrb[1].mxu0 }
  0xec   :  { %v198_v44 = vadd.f32 %v197_v43, %v1803_v40 }
  0xed   :  { %v290_v47 = vmax.f32 %v196_v42, 0.0 }
  0xee   :  { %v201_v45 = vpop.f32.mrb[2].mxu0  ;;  %v291_v46 = vmax.f32 %v198_v44, 0.0 }
  0xef   :  { %v202_v48 = vadd.f32 %v201_v45, %v1799_v39  ;;  %v203_v49 = vpop.f32.mrb[3].mxu0 }
  0xf0   :  { %v204_v50 = vadd.f32 %v203_v49, %v1803_v40  ;;  %462 = vmatprep.mubr.f32.mxu1 %v291_v46 }
  0xf1   :  { %463 = vmatmul.mubr.f32.vlgmr.msra.gmra.mrb[0].mxu1 %v290_v47  ;;  %v292_v53 = vmax.f32 %v202_v48, 0.0 }
  0xf2   :  { %v293_v51 = vmax.f32 %v204_v50, 0.0  ;;  %v207_v52 = vpop.f32.mrb[4].mxu0 }
  0xf3   :  { %v208_v54 = vadd.f32 %v207_v52, %v1799_v39  ;;  %v209_v55 = vpop.f32.mrb[5].mxu0 }
  0xf4   :  { %v210_v56 = vadd.f32 %v209_v55, %v1803_v40  ;;  %468 = vmatprep.mubr.f32.mxu1 %v293_v51 }
  0xf5   :  { %469 = vmatmul.mubr.f32.gmra.mrb[2].mxu1 %v292_v53  ;;  %v294_v59 = vmax.f32 %v208_v54, 0.0 }
  0xf6   :  { %v295_v57 = vmax.f32 %v210_v56, 0.0  ;;  %v213_v58 = vpop.f32.mrb[6].mxu0 }
  0xf7   :  { %v214_v60 = vadd.f32 %v213_v58, %v1799_v39  ;;  %v215_v61 = vpop.f32.mrb[7].mxu0 }
  0xf8   :  { %v216_v62 = vadd.f32 %v215_v61, %v1803_v40  ;;  %474 = vmatprep.mubr.f32.mxu1 %v295_v57 }
  0xf9   :  { %475 = vmatmul.mubr.f32.gmra.mrb[4].mxu1 %v294_v59  ;;  %v296_v2 = vmax.f32 %v214_v60, 0.0 }
  0xfa   :  { %v297_v63 = vmax.f32 %v216_v62, 0.0  ;;  %v219_v1 = vpop.f32.mrb[8].mxu0 }
  0xfb   :  { %v220_v3 = vadd.f32 %v219_v1, %v1799_v39  ;;  %v221_v4 = vpop.f32.mrb[9].mxu0 }
  0xfc   :  { %v222_v5 = vadd.f32 %v221_v4, %v1803_v40  ;;  %480 = vmatprep.mubr.f32.mxu1 %v297_v63 }
  0xfd   :  { %481 = vmatmul.mubr.f32.gmra.mrb[6].mxu1 %v296_v2  ;;  %v298_v8 = vmax.f32 %v220_v3, 0.0 }
  0xfe   :  { %v299_v6 = vmax.f32 %v222_v5, 0.0  ;;  %v225_v7 = vpop.f32.mrb[10].mxu0 }
  0xff   :  { %v226_v9 = vadd.f32 %v225_v7, %v1799_v39  ;;  %v227_v10 = vpop.f32.mrb[11].mxu0 }
 0x100   :  { %v228_v11 = vadd.f32 %v227_v10, %v1803_v40  ;;  %486 = vmatprep.mubr.f32.mxu1 %v299_v6 }
 0x101   :  { %487 = vmatmul.mubr.f32.gmra.mrb[8].mxu1 %v298_v8  ;;  %v300_v14 = vmax.f32 %v226_v9, 0.0 }
 0x102   :  { %v301_v12 = vmax.f32 %v228_v11, 0.0  ;;  %v231_v13 = vpop.f32.mrb[12].mxu0 }
 0x103   :  { %v232_v15 = vadd.f32 %v231_v13, %v1799_v39  ;;  %v233_v16 = vpop.f32.mrb[13].mxu0 }
 0x104   :  { %v234_v17 = vadd.f32 %v233_v16, %v1803_v40  ;;  %492 = vmatprep.mubr.f32.mxu1 %v301_v12  ;;  %v605_v16 = vld [vmem:[%s2019_s5 + $0x70] sm:$0xff] }
 0x105   :  { %493 = vmatmul.mubr.f32.gmra.mrb[10].mxu1 %v300_v14  ;;  %v302_v20 = vmax.f32 %v232_v15, 0.0 }
 0x106   :  { %v303_v18 = vmax.f32 %v234_v17, 0.0  ;;  %v237_v19 = vpop.f32.mrb[14].mxu0  ;;  %v606_v17 = vld [vmem:[%s2019_s5 + $0x78] sm:$0xff] }
 0x107   :  { %v238_v21 = vadd.f32 %v237_v19, %v1799_v39  ;;  %v239_v22 = vpop.f32.mrb[15].mxu0 }
 0x108   :  { %v240_v23 = vadd.f32 %v239_v22, %v1803_v40  ;;  %498 = vmatprep.mubr.f32.mxu1 %v303_v18  ;;  %v1373_v18 = vpack.c.bf16 %v606_v17, %v605_v16 }
 0x109   :  { %499 = vmatmul.mubr.f32.gmra.mrb[12].mxu1 %v302_v20  ;;  %v304_v26 = vmax.f32 %v238_v21, 0.0 }
 0x10a   :  { %v305_v24 = vmax.f32 %v240_v23, 0.0  ;;  %v243_v25 = vpop.f32.mrb[16].mxu0  ;;  %1374 = vmatpush3.bf16.msra.mxu0 %v1373_v18 }
 0x10b   :  { %v244_v27 = vadd.f32 %v243_v25, %v1799_v39  ;;  %v245_v28 = vpop.f32.mrb[17].mxu0 }
 0x10c   :  { %v246_v29 = vadd.f32 %v245_v28, %v1803_v40  ;;  %504 = vmatprep.mubr.f32.mxu1 %v305_v24 }
 0x10d   :  { %505 = vmatmul.mubr.f32.gmra.mrb[14].mxu1 %v304_v26  ;;  %v306_v32 = vmax.f32 %v244_v27, 0.0 }
 0x10e   :  { %v307_v30 = vmax.f32 %v246_v29, 0.0  ;;  %v249_v31 = vpop.f32.mrb[18].mxu0 }
 0x10f   :  { %v250_v33 = vadd.f32 %v249_v31, %v1799_v39  ;;  %v251_v34 = vpop.f32.mrb[19].mxu0 }
 0x110   :  { %v252_v37 = vadd.f32 %v251_v34, %v1803_v40  ;;  %510 = vmatprep.mubr.f32.mxu1 %v307_v30 }
 0x111   :  { %511 = vmatmul.mubr.f32.gmra.mrb[16].mxu1 %v306_v32  ;;  %v308_v43 = vmax.f32 %v250_v33, 0.0 }
 0x112   :  { %v309_v41 = vmax.f32 %v252_v37, 0.0  ;;  %v255_v42 = vpop.f32.mrb[20].mxu0 }
 0x113   :  { %v256_v44 = vadd.f32 %v255_v42, %v1799_v39  ;;  %v257_v45 = vpop.f32.mrb[21].mxu0 }
 0x114   :  { %v258_v46 = vadd.f32 %v257_v45, %v1803_v40  ;;  %516 = vmatprep.mubr.f32.mxu1 %v309_v41 }
 0x115   :  { %517 = vmatmul.mubr.f32.gmra.mrb[18].mxu1 %v308_v43  ;;  %v310_v49 = vmax.f32 %v256_v44, 0.0 }
 0x116   :  { %v311_v47 = vmax.f32 %v258_v46, 0.0  ;;  %v261_v48 = vpop.f32.mrb[22].mxu0 }
 0x117   :  { %v262_v50 = vadd.f32 %v261_v48, %v1799_v39  ;;  %v263_v51 = vpop.f32.mrb[23].mxu0 }
 0x118   :  { %v264_v52 = vadd.f32 %v263_v51, %v1803_v40  ;;  %522 = vmatprep.mubr.f32.mxu1 %v311_v47 }
 0x119   :  { %523 = vmatmul.mubr.f32.gmra.mrb[20].mxu1 %v310_v49  ;;  %v312_v55 = vmax.f32 %v262_v50, 0.0 }
 0x11a   :  { %v313_v53 = vmax.f32 %v264_v52, 0.0  ;;  %v267_v54 = vpop.f32.mrb[24].mxu0 }
 0x11b   :  { %v268_v56 = vadd.f32 %v267_v54, %v1799_v39  ;;  %v269_v57 = vpop.f32.mrb[25].mxu0 }
 0x11c   :  { %v270_v58 = vadd.f32 %v269_v57, %v1803_v40  ;;  %528 = vmatprep.mubr.f32.mxu1 %v313_v53 }
 0x11d   :  { %529 = vmatmul.mubr.f32.gmra.mrb[22].mxu1 %v312_v55  ;;  %v314_v61 = vmax.f32 %v268_v56, 0.0 }
 0x11e   :  { %v315_v59 = vmax.f32 %v270_v58, 0.0  ;;  %v273_v60 = vpop.f32.mrb[26].mxu0 }
 0x11f   :  { %v274_v62 = vadd.f32 %v273_v60, %v1799_v39  ;;  %v275_v63 = vpop.f32.mrb[27].mxu0 }
 0x120   :  { %v276_v1 = vadd.f32 %v275_v63, %v1803_v40  ;;  %534 = vmatprep.mubr.f32.mxu1 %v315_v59 }
 0x121   :  { %535 = vmatmul.mubr.f32.gmra.mrb[24].mxu1 %v314_v61  ;;  %v316_v4 = vmax.f32 %v274_v62, 0.0 }
 0x122   :  { %v317_v2 = vmax.f32 %v276_v1, 0.0  ;;  %v279_v3 = vpop.f32.mrb[28].mxu0 }
 0x123   :  { %v280_v5 = vadd.f32 %v279_v3, %v1799_v39  ;;  %v281_v6 = vpop.f32.mrb[29].mxu0 }
 0x124   :  { %v282_v7 = vadd.f32 %v281_v6, %v1803_v40  ;;  %540 = vmatprep.mubr.f32.mxu1 %v317_v2 }
 0x125   :  { %541 = vmatmul.mubr.f32.gmra.mrb[26].mxu1 %v316_v4  ;;  %v318_v10 = vmax.f32 %v280_v5, 0.0 }
 0x126   :  { %v319_v8 = vmax.f32 %v282_v7, 0.0  ;;  %v285_v9 = vpop.f32.mrb[30].mxu0 }
 0x127   :  { %v286_v11 = vadd.f32 %v285_v9, %v1799_v39  ;;  %v287_v12 = vpop.f32.mrb[31].mxu0  ;;  %v386_v39 = vld [vmem:[%s2018_s4] sm:$0x3] }
 0x128   :  { %v288_v13 = vadd.f32 %v287_v12, %v1803_v40  ;;  %546 = vmatprep.mubr.f32.mxu1 %v319_v8  ;;  %v1848_v40 = vrot.slane %v386_v39, %v72_v36  ;;  %v1852_v19 = vrot.slane %v386_v39, %v76_v38 }
 0x129   :  { %547 = vmatmul.mubr.f32.gmra.mrb[28].mxu1 %v318_v10  ;;  %v320_v15 = vmax.f32 %v286_v11, 0.0 }
 0x12a   :  { %v321_v14 = vmax.f32 %v288_v13, 0.0 }
 0x12c   :  { %552 = vmatprep.mubr.f32.mxu1 %v321_v14 }
 0x12d   :  { %553 = vmatmul.mubr.f32.gmra.mrb[30].mxu1 %v320_v15 }
 0x1c4   :  { %v464_v20 = vpop.f32.mrb[0].mxu1 }
 0x1c5   :  { %v465_v21 = vadd.f32 %v464_v20, %v1848_v40  ;;  %v466_v22 = vpop.f32.mrb[1].mxu1 }
 0x1c6   :  { %v467_v23 = vadd.f32 %v466_v22, %v1852_v19 }
 0x1c7   :  { %v559_v26 = vmax.f32 %v465_v21, 0.0 }
 0x1c8   :  { %v560_v24 = vmax.f32 %v467_v23, 0.0  ;;  %v470_v25 = vpop.f32.mrb[2].mxu1 }
 0x1c9   :  { %v471_v27 = vadd.f32 %v470_v25, %v1848_v40  ;;  %v472_v28 = vpop.f32.mrb[3].mxu1 }
 0x1ca   :  { %v473_v29 = vadd.f32 %v472_v28, %v1852_v19  ;;  %694 = vmatprep.mubr.f32.mxu0 %v560_v24 }
 0x1cb   :  { %695 = vmatmul.mubr.f32.vlgmr.msra.gmra.mrb[32].mxu0 %v559_v26  ;;  %v561_v38 = vmax.f32 %v471_v27, 0.0 }
 0x1cc   :  { %v562_v36 = vmax.f32 %v473_v29, 0.0  ;;  %v476_v35 = vpop.f32.mrb[4].mxu1 }
 0x1cd   :  { %v477_v30 = vadd.f32 %v476_v35, %v1848_v40  ;;  %v478_v31 = vpop.f32.mrb[5].mxu1 }
 0x1ce   :  { %v479_v32 = vadd.f32 %v478_v31, %v1852_v19  ;;  %699 = vmatprep.mubr.f32.mxu0 %v562_v36 }
 0x1cf   :  { %700 = vmatmul.mubr.f32.gmra.mrb[34].mxu0 %v561_v38  ;;  %v563_v37 = vmax.f32 %v477_v30, 0.0 }
 0x1d0   :  { %v564_v33 = vmax.f32 %v479_v32, 0.0  ;;  %v482_v34 = vpop.f32.mrb[6].mxu1 }
 0x1d1   :  { %v483_v41 = vadd.f32 %v482_v34, %v1848_v40  ;;  %v484_v42 = vpop.f32.mrb[7].mxu1 }
 0x1d2   :  { %v485_v43 = vadd.f32 %v484_v42, %v1852_v19  ;;  %704 = vmatprep.mubr.f32.mxu0 %v564_v33 }
 0x1d3   :  { %705 = vmatmul.mubr.f32.gmra.mrb[36].mxu0 %v563_v37  ;;  %v565_v46 = vmax.f32 %v483_v41, 0.0 }
 0x1d4   :  { %v566_v44 = vmax.f32 %v485_v43, 0.0  ;;  %v488_v45 = vpop.f32.mrb[8].mxu1 }
 0x1d5   :  { %v489_v47 = vadd.f32 %v488_v45, %v1848_v40  ;;  %v490_v48 = vpop.f32.mrb[9].mxu1 }
 0x1d6   :  { %v491_v49 = vadd.f32 %v490_v48, %v1852_v19  ;;  %709 = vmatprep.mubr.f32.mxu0 %v566_v44 }
 0x1d7   :  { %710 = vmatmul.mubr.f32.gmra.mrb[38].mxu0 %v565_v46  ;;  %v567_v52 = vmax.f32 %v489_v47, 0.0 }
 0x1d8   :  { %v568_v50 = vmax.f32 %v491_v49, 0.0  ;;  %v494_v51 = vpop.f32.mrb[10].mxu1 }
 0x1d9   :  { %v495_v53 = vadd.f32 %v494_v51, %v1848_v40  ;;  %v496_v54 = vpop.f32.mrb[11].mxu1 }
 0x1da   :  { %v497_v55 = vadd.f32 %v496_v54, %v1852_v19  ;;  %714 = vmatprep.mubr.f32.mxu0 %v568_v50 }
 0x1db   :  { %715 = vmatmul.mubr.f32.gmra.mrb[40].mxu0 %v567_v52  ;;  %v569_v58 = vmax.f32 %v495_v53, 0.0 }
 0x1dc   :  { %v570_v56 = vmax.f32 %v497_v55, 0.0  ;;  %v500_v57 = vpop.f32.mrb[12].mxu1 }
 0x1dd   :  { %v501_v59 = vadd.f32 %v500_v57, %v1848_v40  ;;  %v502_v60 = vpop.f32.mrb[13].mxu1  ;;  %v1541_v57 = vmov 0.0|0.0  }
 0x1de   :  { %v503_v61 = vadd.f32 %v502_v60, %v1852_v19  ;;  %719 = vmatprep.mubr.f32.mxu0 %v570_v56  ;;  %1423 = vmatprep.subr.bf16.mxu0 %v1541_v57 }
 0x1df   :  { %720 = vmatmul.mubr.f32.gmra.mrb[42].mxu0 %v569_v58  ;;  %v571_v1 = vmax.f32 %v501_v59, 0.0  ;;  %v775_v58 = vld [vmem:[%s2021_s7] sm:$0xff] }
 0x1e0   :  { %v572_v62 = vmax.f32 %v503_v61, 0.0  ;;  %v506_v63 = vpop.f32.mrb[14].mxu1  ;;  %1238 = vmatprep.mubr.msk.f32.mxu1 %vm779_vm1, %v775_v58  ;;  %v1895_v61 = vld [vmem:[%s2020_s6] ss:$0 sm:$0xff] }
 0x1e1   :  { %v507_v2 = vadd.f32 %v506_v63, %v1848_v40  ;;  %v508_v3 = vpop.f32.mrb[15].mxu1 }
 0x1e2   :  { %v509_v4 = vadd.f32 %v508_v3, %v1852_v19  ;;  %724 = vmatprep.mubr.f32.mxu0 %v572_v62 }
 0x1e3   :  { %725 = vmatmul.mubr.f32.gmra.mrb[44].mxu0 %v571_v1  ;;  %v573_v7 = vmax.f32 %v507_v2, 0.0 }
 0x1e4   :  { %v574_v5 = vmax.f32 %v509_v4, 0.0  ;;  %v512_v6 = vpop.f32.mrb[16].mxu1 }
 0x1e5   :  { %v513_v8 = vadd.f32 %v512_v6, %v1848_v40  ;;  %v514_v9 = vpop.f32.mrb[17].mxu1 }
 0x1e6   :  { %v515_v10 = vadd.f32 %v514_v9, %v1852_v19  ;;  %729 = vmatprep.mubr.f32.mxu0 %v574_v5 }
 0x1e7   :  { %730 = vmatmul.mubr.f32.gmra.mrb[46].mxu0 %v573_v7  ;;  %v575_v13 = vmax.f32 %v513_v8, 0.0 }
 0x1e8   :  { %v576_v11 = vmax.f32 %v515_v10, 0.0  ;;  %v518_v12 = vpop.f32.mrb[18].mxu1 }
 0x1e9   :  { %v519_v14 = vadd.f32 %v518_v12, %v1848_v40  ;;  %v520_v15 = vpop.f32.mrb[19].mxu1 }
 0x1ea   :  { %v521_v16 = vadd.f32 %v520_v15, %v1852_v19  ;;  %734 = vmatprep.mubr.f32.mxu0 %v576_v11 }
 0x1eb   :  { %735 = vmatmul.mubr.f32.gmra.mrb[48].mxu0 %v575_v13  ;;  %v577_v39 = vmax.f32 %v519_v14, 0.0 }
 0x1ec   :  { %v578_v17 = vmax.f32 %v521_v16, 0.0  ;;  %v524_v18 = vpop.f32.mrb[20].mxu1 }
 0x1ed   :  { %v525_v20 = vadd.f32 %v524_v18, %v1848_v40  ;;  %v526_v21 = vpop.f32.mrb[21].mxu1 }
 0x1ee   :  { %v527_v22 = vadd.f32 %v526_v21, %v1852_v19  ;;  %739 = vmatprep.mubr.f32.mxu0 %v578_v17 }
 0x1ef   :  { %740 = vmatmul.mubr.f32.gmra.mrb[50].mxu0 %v577_v39  ;;  %v579_v25 = vmax.f32 %v525_v20, 0.0 }
 0x1f0   :  { %v580_v23 = vmax.f32 %v527_v22, 0.0  ;;  %v530_v24 = vpop.f32.mrb[22].mxu1 }
 0x1f1   :  { %v531_v26 = vadd.f32 %v530_v24, %v1848_v40  ;;  %v532_v27 = vpop.f32.mrb[23].mxu1 }
 0x1f2   :  { %v533_v28 = vadd.f32 %v532_v27, %v1852_v19  ;;  %744 = vmatprep.mubr.f32.mxu0 %v580_v23 }
 0x1f3   :  { %745 = vmatmul.mubr.f32.gmra.mrb[52].mxu0 %v579_v25  ;;  %v581_v35 = vmax.f32 %v531_v26, 0.0 }
 0x1f4   :  { %v582_v29 = vmax.f32 %v533_v28, 0.0  ;;  %v536_v36 = vpop.f32.mrb[24].mxu1 }
 0x1f5   :  { %v537_v38 = vadd.f32 %v536_v36, %v1848_v40  ;;  %v538_v30 = vpop.f32.mrb[25].mxu1 }
 0x1f6   :  { %v539_v31 = vadd.f32 %v538_v30, %v1852_v19  ;;  %749 = vmatprep.mubr.f32.mxu0 %v582_v29 }
 0x1f7   :  { %750 = vmatmul.mubr.f32.gmra.mrb[54].mxu0 %v581_v35  ;;  %v583_v34 = vmax.f32 %v537_v38, 0.0 }
 0x1f8   :  { %v584_v32 = vmax.f32 %v539_v31, 0.0  ;;  %v542_v33 = vpop.f32.mrb[26].mxu1 }
 0x1f9   :  { %v543_v37 = vadd.f32 %v542_v33, %v1848_v40  ;;  %v544_v41 = vpop.f32.mrb[27].mxu1 }
 0x1fa   :  { %v545_v42 = vadd.f32 %v544_v41, %v1852_v19  ;;  %754 = vmatprep.mubr.f32.mxu0 %v584_v32 }
 0x1fb   :  { %755 = vmatmul.mubr.f32.gmra.mrb[56].mxu0 %v583_v34  ;;  %v585_v45 = vmax.f32 %v543_v37, 0.0 }
 0x1fc   :  { %v586_v43 = vmax.f32 %v545_v42, 0.0  ;;  %v548_v44 = vpop.f32.mrb[28].mxu1 }
 0x1fd   :  { %v549_v46 = vadd.f32 %v548_v44, %v1848_v40  ;;  %v550_v47 = vpop.f32.mrb[29].mxu1 }
 0x1fe   :  { %v551_v48 = vadd.f32 %v550_v47, %v1852_v19  ;;  %759 = vmatprep.mubr.f32.mxu0 %v586_v43 }
 0x1ff   :  { %760 = vmatmul.mubr.f32.gmra.mrb[58].mxu0 %v585_v45  ;;  %v587_v51 = vmax.f32 %v549_v46, 0.0 }
 0x200   :  { %v588_v49 = vmax.f32 %v551_v48, 0.0  ;;  %v554_v50 = vpop.f32.mrb[30].mxu1 }
 0x201   :  { %v555_v52 = vadd.f32 %v554_v50, %v1848_v40  ;;  %v556_v53 = vpop.f32.mrb[31].mxu1 }
 0x202   :  { %v557_v54 = vadd.f32 %v556_v53, %v1852_v19  ;;  %764 = vmatprep.mubr.f32.mxu0 %v588_v49 }
 0x203   :  { %765 = vmatmul.mubr.f32.gmra.mrb[60].mxu0 %v587_v51  ;;  %v589_v56 = vmax.f32 %v555_v52, 0.0 }
 0x204   :  { %v590_v55 = vmax.f32 %v557_v54, 0.0 }
 0x206   :  { %769 = vmatprep.mubr.f32.mxu0 %v590_v55 }
 0x207   :  { %770 = vmatmul.mubr.f32.gmra.mrb[62].mxu0 %v589_v56 }
 0x208   :  { %1276 = vmatprep.mubr.msk.f32.mxu0 %vm1542_vm2, %v1540_v0  ;;  %v778_v0 = vld [vmem:[%s2021_s7 + $0x18] sm:$0xff] }
 0x29e   :  { %v1121_v40 = vpop.f32.mrb[32].mxu0 }
 0x29f   :  { %v1122_v19 = vpop.f32.mrb[33].mxu0 }
 0x2a0   :  { %v1123_v59 = vadd.f32 %v1122_v19, %v1121_v40 }
 0x2a2   :  { %v1124_v60 = vpop.f32.mrb[34].mxu0  ;;  %v697_v1 = vadd.f32 %v1123_v59, %v1895_v61 }
 0x2a3   :  { %v1125_v62 = vpop.f32.mrb[35].mxu0 }
 0x2a4   :  { %v1126_v63 = vadd.f32 %v1125_v62, %v1124_v60 }
 0x2a6   :  { %v702_v2 = vadd.f32 %v1126_v63, %v1895_v61  ;;  %v1127_v3 = vpop.f32.mrb[36].mxu0 }
 0x2a7   :  { %v1128_v4 = vpop.f32.mrb[37].mxu0 }
 0x2a8   :  { %v1375_v5 = vpack.c.bf16 %v702_v2, %v697_v1  ;;  %v1129_v6 = vadd.f32 %v1128_v4, %v1127_v3 }
 0x2aa   :  { %v1130_v7 = vpop.f32.mrb[38].mxu0  ;;  %1377 = vmatprep.subr.msk.bf16.mxu1 %vm1901_vm3, %v1375_v5  ;;  %1426 = vmatpush3.bf16.xpose.msk.msra.mxu0 %vm1901_vm3, %v1375_v5  ;;  %v707_v10 = vadd.f32 %v1129_v6, %v1895_v61  ;;  %v925_v6 = vld [vmem:[%s2022_s8] sm:$0x1]  ;;  %s1543_s8 = smov [#allocation6]  }
 0x2ab   :  { %v1131_v8 = vpop.f32.mrb[39].mxu0  ;;  %1380 = vmatpush3.bf16.xpose.msk.msra.mxu1 %vm1901_vm3, %v1375_v5  ;;  %1427 = vmatprep.subr.bf16.mxu0 %v1541_v57  ;;  %s1022_s25 = sshll.u32 %s1543_s8, 4  ;;  %s1023_s25 = int_to_ptr.vmem [resolvable:$true] %s1022_s25 }
 0x2ac   :  { %v1132_v9 = vadd.f32 %v1131_v8, %v1130_v7  ;;  %s1487_s28 = scalar_lea.vmem %s1023_s25, 16  ;;  %s1491_s29 = scalar_lea.vmem %s1023_s25, 32 }
 0x2ad   :  { %p1488_p8 = scmp.ne.s32.totalorder %s1023_s25, %s1487_s28  ;;  %p1492_p9 = scmp.lt.s32.totalorder %s1023_s25, %s1023_s25 }
 0x2ae   :  { %v712_v11 = vadd.f32 %v1132_v9, %v1895_v61  ;;  %v1133_v12 = vpop.f32.mrb[40].mxu0  ;;  %p1493_p10 = scmp.lt.s32.totalorder %s1491_s29, %s1487_s28 }
 0x2af   :  { %v1134_v13 = vpop.f32.mrb[41].mxu0 }
 0x2b0   :  { %v1381_v14 = vpack.c.bf16 %v712_v11, %v707_v10  ;;  %v1135_v15 = vadd.f32 %v1134_v13, %v1133_v12  ;;  %p1494_p11 = por %p1493_p10, %p1492_p9 }
 0x2b2   :  { %v1136_v16 = vpop.f32.mrb[42].mxu0  ;;  %1383 = vmatprep.subr.msk.bf16.mxu1 %vm1901_vm3, %v1381_v14  ;;  %1430 = vmatpush3.bf16.xpose.msk.msra.mxu0 %vm1901_vm3, %v1381_v14  ;;  %v717_v39 = vadd.f32 %v1135_v15, %v1895_v61  ;;  %p1495_p12 = pnand %p1494_p11, %p1488_p8 }
 0x2b3   :  { %v1137_v17 = vpop.f32.mrb[43].mxu0  ;;  %1386 = vmatpush3.bf16.xpose.msk.msra.mxu1 %vm1901_vm3, %v1381_v14  ;;  %1431 = vmatprep.subr.bf16.mxu0 %v1541_v57 }
 0x2b4   :  { %v1138_v18 = vadd.f32 %v1137_v17, %v1136_v16 }
 0x2b6   :  { %v722_v20 = vadd.f32 %v1138_v18, %v1895_v61  ;;  %v1139_v21 = vpop.f32.mrb[44].mxu0 }
 0x2b7   :  { %v1140_v22 = vpop.f32.mrb[45].mxu0 }
 0x2b8   :  { %v1387_v23 = vpack.c.bf16 %v722_v20, %v717_v39  ;;  %v1141_v24 = vadd.f32 %v1140_v22, %v1139_v21 }
 0x2ba   :  { %v1142_v25 = vpop.f32.mrb[46].mxu0  ;;  %1389 = vmatprep.subr.msk.bf16.mxu1 %vm1901_vm3, %v1387_v23  ;;  %1434 = vmatpush3.bf16.xpose.msk.msra.mxu0 %vm1901_vm3, %v1387_v23  ;;  %v727_v28 = vadd.f32 %v1141_v24, %v1895_v61 }
 0x2bb   :  { %v1143_v26 = vpop.f32.mrb[47].mxu0  ;;  %1392 = vmatpush3.bf16.xpose.msk.msra.mxu1 %vm1901_vm3, %v1387_v23  ;;  %1435 = vmatprep.subr.bf16.mxu0 %v1541_v57 }
 0x2bc   :  { %v1144_v27 = vadd.f32 %v1143_v26, %v1142_v25 }
 0x2be   :  { %v732_v29 = vadd.f32 %v1144_v27, %v1895_v61  ;;  %v1145_v36 = vpop.f32.mrb[48].mxu0 }
 0x2bf   :  { %v1146_v35 = vpop.f32.mrb[49].mxu0 }
 0x2c0   :  { %v1393_v38 = vpack.c.bf16 %v732_v29, %v727_v28  ;;  %v1147_v30 = vadd.f32 %v1146_v35, %v1145_v36 }
 0x2c2   :  { %v1148_v31 = vpop.f32.mrb[50].mxu0  ;;  %1395 = vmatprep.subr.msk.bf16.mxu1 %vm1901_vm3, %v1393_v38  ;;  %1438 = vmatpush3.bf16.xpose.msk.msra.mxu0 %vm1901_vm3, %v1393_v38  ;;  %v737_v34 = vadd.f32 %v1147_v30, %v1895_v61 }
 0x2c3   :  { %v1149_v32 = vpop.f32.mrb[51].mxu0  ;;  %1398 = vmatpush3.bf16.xpose.msk.msra.mxu1 %vm1901_vm3, %v1393_v38  ;;  %1439 = vmatprep.subr.bf16.mxu0 %v1541_v57 }
 0x2c4   :  { %v1150_v33 = vadd.f32 %v1149_v32, %v1148_v31 }
 0x2c6   :  { %v742_v37 = vadd.f32 %v1150_v33, %v1895_v61  ;;  %v1151_v41 = vpop.f32.mrb[52].mxu0 }
 0x2c7   :  { %v1152_v42 = vpop.f32.mrb[53].mxu0 }
 0x2c8   :  { %v1399_v43 = vpack.c.bf16 %v742_v37, %v737_v34  ;;  %v1153_v44 = vadd.f32 %v1152_v42, %v1151_v41 }
 0x2ca   :  { %v1154_v45 = vpop.f32.mrb[54].mxu0  ;;  %1401 = vmatprep.subr.msk.bf16.mxu1 %vm1901_vm3, %v1399_v43  ;;  %1442 = vmatpush3.bf16.xpose.msk.msra.mxu0 %vm1901_vm3, %v1399_v43  ;;  %v747_v48 = vadd.f32 %v1153_v44, %v1895_v61 }
 0x2cb   :  { %v1155_v46 = vpop.f32.mrb[55].mxu0  ;;  %1404 = vmatpush3.bf16.xpose.msk.msra.mxu1 %vm1901_vm3, %v1399_v43  ;;  %1443 = vmatprep.subr.bf16.mxu0 %v1541_v57 }
 0x2cc   :  { %v1156_v47 = vadd.f32 %v1155_v46, %v1154_v45 }
 0x2ce   :  { %v752_v49 = vadd.f32 %v1156_v47, %v1895_v61  ;;  %v1157_v50 = vpop.f32.mrb[56].mxu0 }
 0x2cf   :  { %v1158_v51 = vpop.f32.mrb[57].mxu0 }
 0x2d0   :  { %v1405_v52 = vpack.c.bf16 %v752_v49, %v747_v48  ;;  %v1159_v53 = vadd.f32 %v1158_v51, %v1157_v50 }
 0x2d2   :  { %v1160_v54 = vpop.f32.mrb[58].mxu0  ;;  %1407 = vmatprep.subr.msk.bf16.mxu1 %vm1901_vm3, %v1405_v52  ;;  %1446 = vmatpush3.bf16.xpose.msk.msra.mxu0 %vm1901_vm3, %v1405_v52  ;;  %v757_v58 = vadd.f32 %v1159_v53, %v1895_v61 }
 0x2d3   :  { %v1161_v55 = vpop.f32.mrb[59].mxu0  ;;  %1410 = vmatpush3.bf16.xpose.msk.msra.mxu1 %vm1901_vm3, %v1405_v52  ;;  %1447 = vmatprep.subr.bf16.mxu0 %v1541_v57 }
 0x2d4   :  { %v1162_v56 = vadd.f32 %v1161_v55, %v1160_v54 }
 0x2d6   :  { %v762_v40 = vadd.f32 %v1162_v56, %v1895_v61  ;;  %v1163_v19 = vpop.f32.mrb[60].mxu0 }
 0x2d7   :  { %v1164_v59 = vpop.f32.mrb[61].mxu0 }
 0x2d8   :  { %v1411_v60 = vpack.c.bf16 %v762_v40, %v757_v58  ;;  %v1165_v62 = vadd.f32 %v1164_v59, %v1163_v19 }
 0x2da   :  { %v1166_v63 = vpop.f32.mrb[62].mxu0  ;;  %1413 = vmatprep.subr.msk.bf16.mxu1 %vm1901_vm3, %v1411_v60  ;;  %1450 = vmatpush3.bf16.xpose.msk.msra.mxu0 %vm1901_vm3, %v1411_v60  ;;  %v767_v3 = vadd.f32 %v1165_v62, %v1895_v61 }
 0x2db   :  { %v1167_v1 = vpop.f32.mrb[63].mxu0  ;;  %1416 = vmatpush3.bf16.xpose.msk.msra.mxu1 %vm1901_vm3, %v1411_v60  ;;  %1451 = vmatprep.subr.bf16.mxu0 %v1541_v57  ;;  %v776_v57 = vld [vmem:[%s2021_s7 + $0x8] sm:$0xff] }
 0x2dc   :  { %v1168_v2 = vadd.f32 %v1167_v1, %v1166_v63 }
 0x2de   :  { %v772_v4 = vadd.f32 %v1168_v2, %v1895_v61  ;;  %v777_v61 = vld [vmem:[%s2021_s7 + $0x10] sm:$0xff] }
 0x2e0   :  { %v1417_v5 = vpack.c.bf16 %v772_v4, %v767_v3 }
 0x2e2   :  { %1419 = vmatprep.subr.msk.bf16.mxu1 %vm1901_vm3, %v1417_v5  ;;  %1454 = vmatpush3.bf16.xpose.msk.msra.mxu0 %vm1901_vm3, %v1417_v5 }
 0x2e3   :  { %1422 = vmatpush3.bf16.xpose.msk.msra.mxu1 %vm1901_vm3, %v1417_v5 }
 0x2e9   :  { %1277 = vmatmul.mubr.msk.f32.vlgmr.msra.gmra.mrb[64].mxu0 %vm779_vm1, %v925_v6 }
 0x2ea   :  { %1239 = vmatmul.mubr.msk.f32.vlgmr.msra.gmra.mrb[32].mxu1 %vm779_vm1, %v776_v57 }
 0x2eb   :  { %1241 = vmatprep.mubr.msk.f32.mxu1 %vm779_vm1, %v777_v61 }
 0x2ee   :  { %1242 = vmatmul.mubr.msk.f32.gmra.mrb[34].mxu1 %vm779_vm1, %v778_v0 }
 0x3bc   :  { %v995_v7 = vpop.f32.mrb[64].mxu0 }
 0x3bd   :  { %v1240_v8 = vpop.f32.mrb[32].mxu1  ;;  %1003 = vst [vmem:[#allocation6] sm:$0x1] %v995_v7  ;;  %v1278_v9 = vpop.f32.mrb[65].mxu0 }
 0x3be   :  { %1000 = vst [vmem:[#allocation5 + $0x8] sm:$0xff] %v1240_v8  ;;  %v906_v10 = vpop.f32.mrb[33].mxu1 }
 0x3bf   :  { %1498 = shalt.err (!%p1495_p12)
}
 0x3c0   :  { %s1499_s11 = scalar_lea.hbm %s2024_s10, 16 }
 0x3c1   :  { %p1500_p13 = scmp.ne.s32.totalorder %s2024_s10, %s1499_s11  ;;  %p1503_p0 = scmp.lt.u32.totalorder %s1499_s11, %s2024_s10 }
 0x3c3   :  { %p1505_p1 = pnand %p1503_p0, %p1500_p13 }
 0x3c5   :  { %1508 = shalt.err (!%p1505_p1)
}
 0x3c6   :  { %1025 = dma.vmem_to_hbm [thread:$0]  %s1023_s25, 16, %s2024_s10, [#allocation7]   ;;  %999 = vst [vmem:[#allocation5] sm:$0xff] %v906_v10  ;;  %v1243_v11 = vpop.f32.mrb[34].mxu1 }
 0x3c7   :  { %1002 = vst [vmem:[#allocation5 + $0x18] sm:$0xff] %v1243_v11  ;;  %v916_v12 = vpop.f32.mrb[35].mxu1  ;;  %s1509_s1 = scalar_lea.vmem %s1010_s27, 512  ;;  %p1514_p3 = scmp.lt.s32.totalorder %s1010_s27, %s1010_s27 }
 0x3c8   :  { %1001 = vst [vmem:[#allocation5 + $0x10] sm:$0xff] %v916_v12  ;;  %p1510_p2 = scmp.ne.s32.totalorder %s1010_s27, %s1509_s1  ;;  %p1515_p4 = scmp.lt.s32.totalorder %s1509_s1, %s1509_s1 }
 0x3ca   :  { %p1516_p5 = por %p1515_p4, %p1514_p3 }
 0x3cc   :  { %p1517_p6 = pnand %p1516_p5, %p1510_p2 }
 0x3ce   :  { %1520 = shalt.err (!%p1517_p6)
}
 0x3cf   :  { %s1521_s5 = scalar_lea.hbm %s2023_s9, 512 }
 0x3d0   :  { %p1522_p7 = scmp.ne.s32.totalorder %s2023_s9, %s1521_s5  ;;  %p1525_p8 = scmp.lt.u32.totalorder %s1521_s5, %s2023_s9 }
 0x3d2   :  { %p1527_p9 = pnand %p1525_p8, %p1522_p7 }
 0x3d4   :  { %1530 = shalt.err (!%p1527_p9)
}
 0x3d5   :  { %s1545_s19 = smov 128   ;;  %s1546_s20 = smov 8  }
 0x3d6   :  { %1015 = dma.vmem_to_hbm [thread:$0]  %s1010_s27, 512, %s2023_s9, [#allocation4], %s1545_s19, %s1545_s19, %s1546_s20  }
 0x3d7   :  { %1533 = dma.done.wait [#allocation4], 512  }
 0x3d8   :  { %1534 = vsyncadd [#allocation4], 4294966784 }
 0x3d9   :  { %1535 = dma.done.wait [#allocation7], 16  }
 0x3da   :  { %1536 = vsyncadd [#allocation7], 4294967280 }
 0x3db   :  { %1032 = vsyncpa [#allocation3], 1 }
 0x3dc   :  { %1033 = vsyncpa [#allocation4], 1 }
 0x3dd   :  { %1034 = vsyncpa [#allocation7], 1 }

</bundles_post_ra>
